<compile_context>
chip_gen: v7x
topology: tpu7x:2x2x1
jax: 0.10.0
libtpu: 0.0.40
codegen_flags: <defaults>
</compile_context>

<pallas_src>
import functools
from types import SimpleNamespace

import jax
import jax.numpy as jnp
from jax.experimental import pallas as pl
from jax.experimental.pallas import tpu as pltpu

_SUBLANE = 8
_LANE = 128

# Pallas is only worth it once the class dim fills vregs; tiny-C heads waste
# >=96% of every vreg and are dominated by launch/grid-step overhead.
_MIN_PALLAS_CLASSES = 128
_MIN_PALLAS_ROWS = 64
# Switch to the class-tiled (flash-softmax) kernel when one C-wide row costs
# more than this many bytes (input double-buffer + f32 temps).
_MAX_SINGLE_BLOCK_ROW_BYTES = 256 * 1024


def _round_up(x, m):
    return ((x + m - 1) // m) * m


@functools.lru_cache(maxsize=None)
def _vmem_budget():
    """(logits+temps budget bytes, scoped vmem_limit_bytes) per TPU generation."""
    try:
        info = pltpu.get_tpu_info()
        vmem = int(getattr(info, "vmem_capacity_bytes", 64 * 1024 * 1024))
    except Exception:
        vmem = 64 * 1024 * 1024            # unknown backend -> assume smallest (v7x)
    if vmem >= 100 * 1024 * 1024:          # v5e / v6e: 128 MiB physical VMEM
        return 40 * 1024 * 1024, 96 * 1024 * 1024
    return 20 * 1024 * 1024, 44 * 1024 * 1024   # v7x: 64 MiB per TensorCore


def _pick_tile(n_rows, n_cls, itemsize, budget):
    """Largest 8-aligned row tile whose (double-buffered inputs + f32 temps) fit."""
    # 2x pipelined native-dtype input block + ~4 f32 full-tile temporaries
    # (upcast logits, col iota, compare/select, exp).
    per_row = 2 * n_cls * itemsize + 4 * n_cls * 4
    tn = budget // max(per_row, 1)
    tn = max(_SUBLANE, min(int(tn), 1024))
    tn = (tn // _SUBLANE) * _SUBLANE
    # v7x megacore: make sure big heads produce >= 2 grid steps so the
    # "parallel" grid axis can actually be split across both TensorCores.
    if n_rows >= 16 * _SUBLANE:
        tn = min(tn, _round_up(pl.cdiv(n_rows, 2), _SUBLANE))
    # Never let the block exceed the array's row extent.
    tn = min(tn, max(_SUBLANE, (n_rows // _SUBLANE) * _SUBLANE))
    return max(tn, _SUBLANE)


# --------------------------------------------------------------------------
# Kernel A: class dim fits in a single block; one partial sum per row tile.
# --------------------------------------------------------------------------
def _ce_sum_kernel(logits_ref, tgt_ref, out_ref, *, n_rows, tile):
    """CE partial sum over one row tile.

    logits_ref: (TN, C) native dtype (upcast to f32 once in-kernel)
    tgt_ref:    (TN, 1) int32
    out_ref:    (1, 8, 128) f32 -- lane-dense block holding this tile's partial
                sum broadcast over the block; wrapper reads [:, 0, 0].
    Tail rows of a partial tile are masked AFTER the per-row reduction (rows
    cannot contaminate each other) and before the tile sum.
    """
    i = pl.program_id(0)
    logits = logits_ref[...].astype(jnp.float32)                   # (TN, C)
    tn, c = logits.shape

    m = jnp.max(logits, axis=-1, keepdims=True)                    # (TN, 1)
    shifted = logits - m                                            # reused twice
    col = jax.lax.broadcasted_iota(jnp.int32, (tn, c), 1)
    t = tgt_ref[...]                                                # (TN, 1)
    picked = jnp.sum(jnp.where(col == t, shifted, 0.0), axis=-1, keepdims=True)
    lse_sh = jnp.log(jnp.sum(jnp.exp(shifted), axis=-1, keepdims=True))
    row_loss = lse_sh - picked               # == logsumexp(logits) - logits[t]

    row = i * tile + jax.lax.broadcasted_iota(jnp.int32, (tn, 1), 0)
    tile_sum = jnp.sum(jnp.where(row < n_rows, row_loss, 0.0))
    out_ref[...] = jnp.full(out_ref.shape, tile_sum, dtype=jnp.float32)


def _ce_sum_singleblock(logits, targets):
    n, c = logits.shape
    budget, limit = _vmem_budget()
    tn = _pick_tile(n, c, jnp.dtype(logits.dtype).itemsize, budget)
    grid = pl.cdiv(n, tn)
    tgt = targets.astype(jnp.int32).reshape(n, 1)

    kernel = functools.partial(_ce_sum_kernel, n_rows=n, tile=tn)
    partial = pl.pallas_call(
        kernel,
        out_shape=jax.ShapeDtypeStruct((grid, _SUBLANE, _LANE), jnp.float32),
        grid=(grid,),
        in_specs=[
            pl.BlockSpec((tn, c), lambda i: (i, 0)),    # logits, native dtype
            pl.BlockSpec((tn, 1), lambda i: (i, 0)),    # int32 targets
        ],
        out_specs=pl.BlockSpec((1, _SUBLANE, _LANE), lambda i: (i, 0, 0)),
        compiler_params=pltpu.CompilerParams(
            dimension_semantics=("parallel",),
            vmem_limit_bytes=limit,
        ),
    )(logits, tgt)
    return jnp.sum(partial[:, 0, 0])


# --------------------------------------------------------------------------
# Kernel B: class-tiled (flash-softmax) CE for very large vocabularies.
# --------------------------------------------------------------------------
def _ce_sum_classtiled_kernel(logits_ref, tgt_ref, out_ref, m_sc, l_sc, p_sc,
                              *, n_rows, n_cls, row_tile, cls_tile):
    i = pl.program_id(0)
    j = pl.program_id(1)
    nj = pl.num_programs(1)

    @pl.when(j == 0)
    def _():
        m_sc[...] = jnp.full(m_sc.shape, -jnp.inf, dtype=jnp.float32)
        l_sc[...] = jnp.zeros(l_sc.shape, dtype=jnp.float32)
        p_sc[...] = jnp.zeros(p_sc.shape, dtype=jnp.float32)

    logits = logits_ref[...].astype(jnp.float32)                    # (TN, TC)
    tn, tc = logits.shape
    col = j * cls_tile + jax.lax.broadcasted_iota(jnp.int32, (tn, tc), 1)
    if n_cls % cls_tile != 0:            # static: mask padded class columns
        logits = jnp.where(col < n_cls, logits, -jnp.inf)

    t = tgt_ref[...]                                                # (TN, 1)
    # The target column lives in exactly one class tile -> accumulate raw pick.
    p_sc[...] += jnp.sum(jnp.where(col == t, logits, 0.0), axis=-1, keepdims=True)

    m_prev = m_sc[...]
    m_new = jnp.maximum(m_prev, jnp.max(logits, axis=-1, keepdims=True))
    alpha = jnp.exp(m_prev - m_new)
    l_sc[...] = alpha * l_sc[...] + jnp.sum(jnp.exp(logits - m_new),
                                            axis=-1, keepdims=True)
    m_sc[...] = m_new

    @pl.when(j == nj - 1)
    def _():
        row_loss = m_sc[...] + jnp.log(l_sc[...]) - p_sc[...]        # (TN, 1)
        row = i * row_tile + jax.lax.broadcasted_iota(jnp.int32, (row_tile, 1), 0)
        tile_sum = jnp.sum(jnp.where(row < n_rows, row_loss, 0.0))
        out_ref[...] = jnp.full(out_ref.shape, tile_sum, dtype=jnp.float32)


def _ce_sum_classtiled(logits, targets, *, row_tile=None, cls_tile=None):
    n, c = logits.shape
    budget, limit = _vmem_budget()
    if cls_tile is None:
        cls_tile = min(_round_up(c, _LANE), 2048)
    if row_tile is None:
        row_tile = _pick_tile(n, cls_tile, jnp.dtype(logits.dtype).itemsize, budget)
    grid_r = pl.cdiv(n, row_tile)
    grid_c = pl.cdiv(c, cls_tile)
    tgt = targets.astype(jnp.int32).reshape(n, 1)

    kernel = functools.partial(_ce_sum_classtiled_kernel, n_rows=n, n_cls=c,
                               row_tile=row_tile, cls_tile=cls_tile)
    partial = pl.pallas_call(
        kernel,
        out_shape=jax.ShapeDtypeStruct((grid_r, _SUBLANE, _LANE), jnp.float32),
        grid=(grid_r, grid_c),
        in_specs=[
            pl.BlockSpec((row_tile, cls_tile), lambda i, j: (i, j)),
            pl.BlockSpec((row_tile, 1), lambda i, j: (i, 0)),
        ],
        out_specs=pl.BlockSpec((1, _SUBLANE, _LANE), lambda i, j: (i, 0, 0)),
        scratch_shapes=[pltpu.VMEM((row_tile, 1), jnp.float32)] * 3,
        compiler_params=pltpu.CompilerParams(
            dimension_semantics=("parallel", "arbitrary"),
            vmem_limit_bytes=limit,
        ),
    )(logits, tgt)
    return jnp.sum(partial[:, 0, 0])


# --------------------------------------------------------------------------
# Dispatch + tiny-class jnp fast path.
# --------------------------------------------------------------------------
def _ce_rows_jnp(logits, targets):
    logits = logits.astype(jnp.float32)
    lse = jax.nn.logsumexp(logits, axis=-1)
    picked = jnp.take_along_axis(logits, targets.astype(jnp.int32)[:, None],
                                 axis=-1)[:, 0]
    return lse - picked


def ce_sum(logits, targets):
    """Sum over rows of CE(logits[r, :], targets[r]); logits class-last [N, C]."""
    n, c = logits.shape
    if c < _MIN_PALLAS_CLASSES or n < _MIN_PALLAS_ROWS:
        # Tiny heads: every vreg would be mostly lane padding and launch
        # overhead dominates -> plain jnp, XLA fuses it.
        return jnp.sum(_ce_rows_jnp(logits, targets))
    row_bytes = c * (2 * jnp.dtype(logits.dtype).itemsize + 16)
    if row_bytes > _MAX_SINGLE_BLOCK_ROW_BYTES:
        return _ce_sum_classtiled(logits, targets)
    return _ce_sum_singleblock(logits, targets)


def ce_mean(logits, targets):
    """PyTorch CrossEntropyLoss(reduction='mean') with class-last logits.

    TODO(synk): no ignore_index handling -- the reference criteria are assumed
    to be plain CrossEntropyLoss(mean) as constructed by default.
    """
    return ce_sum(logits, targets) / jnp.float32(logits.shape[0])


# --------------------------------------------------------------------------
# JointLoss forward (need_info=False).
# --------------------------------------------------------------------------
class JointLossPallas:
    def __init__(self, args, size_average=True, denomitor=1e-08):
        self.args = args
        self.average = size_average
        self.max_gen = args.max_generate
        self.denomitor = denomitor
        self.gamma = getattr(args, "swloss_gamma", 0.01)

    def pointer_loss(self, logits, gts, masks=None):
        # logits: (B, C=L, L), PyTorch CE class dim 1 -> class-last 2-D view.
        b, c, l = logits.shape
        # TODO(synk): for large L, fold this transpose into the kernel BlockSpec
        # (XLU transpose in VMEM) to avoid the extra HBM round trip; at this
        # model's L the tiny-class jnp path is used and XLA fuses the transpose.
        logits_2d = jnp.transpose(logits, (0, 2, 1)).reshape(b * l, c)
        label_loss = ce_mean(logits_2d, gts.reshape(b * l))
        # TODO(synk): masks-driven order_loss branch never exercised by forward()
        # (masks=None) and is not implemented.
        return label_loss

    def tagger_loss(self, tagger_preds, tagger_truth):
        tagger_logits, ins_logits, mod_logits = tagger_preds   # each (B, L, C)
        tagger_gts, ins_gts, mod_gts = tagger_truth            # each (B, L)
        b, l, ct = tagger_logits.shape
        # permute(0,2,1) + CE(class dim 1)  ==  class-last CE on (B*L, C).
        tag_loss = ce_mean(tagger_logits.reshape(b * l, ct), tagger_gts.reshape(-1))
        _, _, co = ins_logits.shape
        insert_loss = ce_mean(ins_logits.reshape(b * l, co), ins_gts.reshape(-1))
        modify_loss = ce_mean(mod_logits.reshape(b * l, co), mod_gts.reshape(-1))
        # Scalar where reproduces Torch's `if torch.max(gts) > 0` gating (the
        # unselected scalar branch cannot leak into the result).
        loss = tag_loss
        loss = loss + jnp.where(jnp.max(ins_gts) > 0, insert_loss, 0.0)
        loss = loss + jnp.where(jnp.max(mod_gts) > 0, modify_loss, 0.0)
        return loss

    def __call__(self, preds, gts, switch_mask=None):
        # binary + 7 error-type heads: tiny class counts -> jnp CE path
        # (no HBM concat copies, no Pallas launch overhead).
        binary_loss = ce_mean(preds["binary"], gts["binary"])
        type_loss = sum(ce_mean(preds["type"][k], gts["type"][:, k])
                        for k in range(7))
        # switch (pointer) head; forward() always passes masks=None.
        pointer_l = self.pointer_loss(preds["switch"], gts["switch"], None)
        # tagger head.
        tagger_l = self.gamma * self.tagger_loss(preds["tagger"], gts["tagger"])
        # MLM / generate head: LogSoftmax(dim=-1) + NLLLoss == class-last CE;
        # this is the large-vocab head that actually uses the Pallas kernels.
        loss_mlm = ce_mean(preds["generate"], gts["generate"])

        total = binary_loss + type_loss + pointer_l + tagger_l
        total = total + jnp.where(jnp.isnan(loss_mlm), 0.0, loss_mlm)
        return total


if __name__ == "__main__":
    key = jax.random.PRNGKey(0)

    # ---- kernel self-tests (validated against plain-jnp CE) ----------------
    k1, k2, k3, k4, key = jax.random.split(key, 5)

    # Single-class-block kernel: multi-tile grid + masked partial tail tile.
    xa = jax.random.normal(k1, (200, 256), jnp.float32)
    ta = jax.random.randint(k2, (200,), 0, 256, jnp.int32)
    got_a = ce_mean(xa, ta)                               # Pallas single-block path
    ref_a = jnp.mean(_ce_rows_jnp(xa, ta))
    jax.block_until_ready(got_a)
    assert bool(jnp.allclose(got_a, ref_a, rtol=1e-4, atol=1e-4)), (got_a, ref_a)

    # Class-tiled (flash-softmax) kernel: 2x4 grid, partial row tail.
    xb = jax.random.normal(k3, (100, 512), jnp.float32)
    tb = jax.random.randint(k4, (100,), 0, 512, jnp.int32)
    got_b = _ce_sum_classtiled(xb, tb, row_tile=64, cls_tile=128) / jnp.float32(100)
    ref_b = jnp.mean(_ce_rows_jnp(xb, tb))
    jax.block_until_ready(got_b)
    assert bool(jnp.allclose(got_b, ref_b, rtol=1e-4, atol=1e-4)), (got_b, ref_b)

    # ---- JointLoss forward demo --------------------------------------------
    B, L, C_BIN, C_TYPE, C_TAG, C_OPS, V, MAX_GEN = 4, 16, 2, 2, 5, 3, 512, 16

    keys = jax.random.split(key, 24)
    ki = iter(keys)
    preds = {
        "binary": jax.random.normal(next(ki), (B, C_BIN), jnp.float32),
        "type": [jax.random.normal(next(ki), (B, C_TYPE), jnp.float32)
                 for _ in range(7)],
        # switch logits: (B, C=L, L) -- PyTorch CE class dim is dim 1
        "switch": jax.random.normal(next(ki), (B, L, L), jnp.float32),
        "tagger": [
            jax.random.normal(next(ki), (B, L, C_TAG), jnp.float32),
            jax.random.normal(next(ki), (B, L, C_OPS), jnp.float32),
            jax.random.normal(next(ki), (B, L, C_OPS), jnp.float32),
        ],
        "generate": jax.random.normal(next(ki), (B * MAX_GEN, V), jnp.float32),
    }
    gts = {
        "binary": jax.random.randint(next(ki), (B,), 0, C_BIN, jnp.int32),
        "type": jax.random.randint(next(ki), (B, 7), 0, C_TYPE, jnp.int32),
        "switch": jax.random.randint(next(ki), (B, L), 0, L, jnp.int32),
        "tagger": [
            jax.random.randint(next(ki), (B, L), 0, C_TAG, jnp.int32),
            jax.random.randint(next(ki), (B, L), 0, C_OPS, jnp.int32),
            jax.random.randint(next(ki), (B, L), 0, C_OPS, jnp.int32),
        ],
        "generate": jax.random.randint(next(ki), (B * MAX_GEN,), 0, V, jnp.int32),
    }

    args = SimpleNamespace(max_generate=MAX_GEN, swloss_gamma=0.01)
    loss_fn = JointLossPallas(args)

    total_loss = loss_fn(preds, gts)
    jax.block_until_ready(total_loss)
    assert total_loss.shape == () and bool(jnp.isfinite(total_loss))
    print("KERNEL_OK")
</pallas_src>

<mosaic_0001>
module attributes {stable_mosaic.version = 11 : i64} {
  func.func @_ce_sum_kernel(%arg0: i32, %arg1: memref<104x256xf32, #tpu.memory_space<vmem>>, %arg2: memref<104x1xi32, #tpu.memory_space<vmem>>, %arg3: memref<1x8x128xf32, #tpu.memory_space<vmem>>) attributes {dimension_semantics = [#tpu.dimension_semantics<parallel>], iteration_bounds = array<i64: 2>, scalar_prefetch = 0 : i64, scratch_operands = 0 : i64, tpu.core_type = #tpu.core_type<tc>, window_params = [{transform_indices = @transform_0, window_bounds = array<i64: 104, 256>}, {transform_indices = @transform_1, window_bounds = array<i64: 104, 1>}, {transform_indices = @transform_2, window_bounds = array<i64: 1, 8, 128>}]} {
    %c0 = arith.constant 0 : index
    %c0_0 = arith.constant 0 : index
    %0 = vector.load %arg1[%c0, %c0_0] : memref<104x256xf32, #tpu.memory_space<vmem>>, vector<104x256xf32>
    %cst = arith.constant dense<0xFF800000> : vector<104xf32>
    %1 = vector.multi_reduction <maximumf>, %0, %cst [1] : vector<104x256xf32> to vector<104xf32>
    %2 = vector.shape_cast %1 : vector<104xf32> to vector<104x1xf32>
    %3 = vector.broadcast %2 : vector<104x1xf32> to vector<104x256xf32>
    %4 = arith.subf %0, %3 : vector<104x256xf32>
    %5 = tpu.iota {dimensions = array<i32: 1>} : vector<104x256xi32>
    %c0_1 = arith.constant 0 : index
    %c0_2 = arith.constant 0 : index
    %6 = vector.load %arg2[%c0_1, %c0_2] : memref<104x1xi32, #tpu.memory_space<vmem>>, vector<104x1xi32>
    %7 = vector.broadcast %6 : vector<104x1xi32> to vector<104x256xi32>
    %8 = arith.cmpi eq, %5, %7 : vector<104x256xi32>
    %cst_3 = arith.constant 0.000000e+00 : f32
    %9 = vector.broadcast %cst_3 : f32 to vector<104x256xf32>
    %10 = arith.select %8, %4, %9 : vector<104x256xi1>, vector<104x256xf32>
    %cst_4 = arith.constant dense<0.000000e+00> : vector<104xf32>
    %11 = vector.multi_reduction <add>, %10, %cst_4 [1] : vector<104x256xf32> to vector<104xf32>
    %12 = vector.shape_cast %11 : vector<104xf32> to vector<104x1xf32>
    %13 = math.exp %4 : vector<104x256xf32>
    %cst_5 = arith.constant dense<0.000000e+00> : vector<104xf32>
    %14 = vector.multi_reduction <add>, %13, %cst_5 [1] : vector<104x256xf32> to vector<104xf32>
    %15 = vector.shape_cast %14 : vector<104xf32> to vector<104x1xf32>
    %16 = math.log %15 : vector<104x1xf32>
    %17 = arith.subf %16, %12 : vector<104x1xf32>
    %c104_i32 = arith.constant 104 : i32
    %18 = arith.muli %arg0, %c104_i32 : i32
    %19 = tpu.iota {dimensions = array<i32: 0>} : vector<104x1xi32>
    %20 = vector.broadcast %18 : i32 to vector<104x1xi32>
    %21 = arith.addi %20, %19 : vector<104x1xi32>
    %c200_i32 = arith.constant 200 : i32
    %22 = vector.broadcast %c200_i32 : i32 to vector<104x1xi32>
    %23 = arith.cmpi slt, %21, %22 : vector<104x1xi32>
    %cst_6 = arith.constant 0.000000e+00 : f32
    %24 = vector.broadcast %cst_6 : f32 to vector<104x1xf32>
    %25 = arith.select %23, %17, %24 : vector<104x1xi1>, vector<104x1xf32>
    %26 = vector.shape_cast %25 : vector<104x1xf32> to vector<1x104x1xf32>
    %cst_7 = arith.constant dense<0.000000e+00> : vector<1xf32>
    %27 = vector.multi_reduction <add>, %26, %cst_7 [1, 2] : vector<1x104x1xf32> to vector<1xf32>
    %28 = vector.shape_cast %27 : vector<1xf32> to vector<1x1x1xf32>
    %29 = vector.extract %28[0, 0, 0] : f32 from vector<1x1x1xf32>
    %30 = vector.broadcast %29 : f32 to vector<1x8x128xf32>
    %c0_8 = arith.constant 0 : index
    %c0_9 = arith.constant 0 : index
    %c0_10 = arith.constant 0 : index
    %31 = vector.load %arg3[%c0_8, %c0_9, %c0_10] : memref<1x8x128xf32, #tpu.memory_space<vmem>>, vector<1x8x128xf32>
    tpu.vector_store %arg3[%c0_8, %c0_9, %c0_10], %30 {strides = array<i32>} : memref<1x8x128xf32, #tpu.memory_space<vmem>>, vector<1x8x128xf32>,
    return
  }
  func.func @transform_0(%arg0: i32) -> (i32, i32) {
    %c0_i32 = arith.constant 0 : i32
    %c0_i32_0 = arith.constant 0 : i32
    return %arg0, %c0_i32 : i32, i32
  }
  func.func @transform_1(%arg0: i32) -> (i32, i32) {
    %c0_i32 = arith.constant 0 : i32
    %c0_i32_0 = arith.constant 0 : i32
    return %arg0, %c0_i32 : i32, i32
  }
  func.func @transform_2(%arg0: i32) -> (i32, i32, i32) {
    %c0_i32 = arith.constant 0 : i32
    %c0_i32_0 = arith.constant 0 : i32
    %c0_i32_1 = arith.constant 0 : i32
    return %arg0, %c0_i32, %c0_i32_0 : i32, i32, i32
  }
}

</mosaic_0001>

<bundles_post_ra>
// kernel: tpu_custom_call.1
= control target key start
LH: loop header
LB: loop body
LE: loop exit
PB: predicated region body
PF: predicated region fallthrough
CT: control target
= control target key end

     0   :  { %7 = vsyncpa [#allocation3], 0  ;;  %s1553_s0 = inlined_call_operand.hbm [shape: f32[200,256], index: 0, kind: input, shape index: {}]   ;;  %s1554_s1 = inlined_call_operand.vmem [shape: s32[200,1], index: 1, kind: input, shape index: {}]   ;;  %s1555_s2 = inlined_call_operand.hbm [shape: f32[2,8,128], index: 2, kind: output, shape index: {}]  }
   0x1   :  { %9 = vsyncpa [#allocation3 + $0x1], 0 }
   0x2   :  { %10 = vsyncpa [#allocation4], 0 }
   0x3   :  { %12 = vsyncpa [#allocation4 + $0x1], 0  ;;  %s1037_s9 = smov 0   ;;  %s1039_s10 = smov 0  }
   0x4   :  { %s1041_s11 = smov 0   ;;  %s1043_s12 = smov 0  }
   0x5 LB: > { %s1058_s13 = sadd.s32 4294967295, %s1015_s12   ;;  %s773_s14 = sadd.s32 4294967294, %s1015_s12   ;;  %s1015_s12 = sphi %s1043_s12, %s1565_s12   ;;  %s1011_s11 = sphi %s1041_s11, %s1564_s11   ;;  %s1007_s10 = sphi %s1039_s10, %s1563_s10   ;;  %s1003_s9 = sphi %s1037_s9, %s1562_s9  }
   0x6   : > { %s1062_s15 = sadd.s32 1, %s1015_s12   ;;  %s25_s16 = sadd.s32 1, %s1011_s11 }
   0x7   : > { %s22_s17 = ssub.s32 %s1015_s12, %s1062_s15  ;;  %p32_p0 = scmp.ne.s32.totalorder %s1011_s11, %s1007_s10 }
   0x8   : > { %p23_p1 = scmp.eq.s32.totalorder %s22_s17, 0  ;;  %p33_p2 = scmp.eq.s32.totalorder %s1015_s12, 0 }
   0x9   : > { %p38_p3 = scmp.ne.s32.totalorder %s1007_s10, %s1003_s9  ;;  %p39_p4 = scmp.eq.s32.totalorder %s1058_s13, 0 }
   0xa   : > { %s1074_s18 = scalar_select %p23_p1, %s1011_s11, %s25_s16  }
   0xb   : > { %p34_p5 = por %p33_p2, %p32_p0  ;;  %p1076_p6 = por %p39_p4, %p38_p3 }
   0xc   : > { %p88_p7 = scmp.eq.s32.totalorder %s1058_s13, 1  ;;  %p94_p8 = scmp.eq.s32.totalorder %s773_s14, 1 }
   0xd   : > { %p1556_p11 = scmp.ge.s32.totalorder %s1015_s12, 2 }
   0xe   : > { %p1081_p9 = por %p88_p7, %p32_p0  ;;  %p1085_p10 = por %p94_p8, %p38_p3 }
   0xf   : > { %110 = sbr.rel (%p1556_p11) target bundleno = 57 (0x39), region = 16 }
  0x10   : > { %s1559_s21 = scalar_select %p1085_p10, 1, 0 }
  0x16   : > { %113 = sbr.rel (!%p34_p5) target bundleno = 57 (0x39), region = 20  ;;  %s114_s22 = sand.u32 (%p34_p5), 1, %s1011_s11  }
  0x17   : > { %s119_s23 = smul.u32 (%p34_p5), 13, %s1015_s12  ;;  %s1097_s28 = scalar_lea.sflag (%p34_p5), [#allocation3], %s114_s22 }
  0x18   : > { %s794_s24 = smul.u32 (%p34_p5), 208, %s114_s22 }
  0x19   : > { %s120_s25 = ssub.s32 (%p34_p5), 25, %s119_s23 }
  0x1a   : > { %p121_p12 = scmp.lt.s32.totalorder (%p34_p5), %s120_s25, 13  ;;  %s118_s29 = scalar_lea.vmem (%p34_p5), [#allocation2], %s794_s24 }
  0x1d   : > { %s1567_s25 = smov (!%p121_p12, %s120_s25), 13 }
  0x1e   : > { %s1094_s26 = sshll.u32 %s1567_s25, 8 }
  0x1f   : > { %s126_s27 = ssub.s32 3328, %s1094_s26 }
  0x20   : > { %127 = vsyncadd %s1097_s28, %s126_s27  ;;  %p778_p13 = scmp.ne.s32.totalorder %s1094_s26, 0  ;;  %s793_s30 = smul.u32 3328, %s1015_s12 }
  0x21   : > { %s133_s3 = sshll.u32 %s118_s29, 4  ;;  %s925_s16 = scalar_lea.hbm %s1553_s0, 6400  ;;  %s1107_s3 = int_to_ptr.vmem [resolvable:$true] %s133_s3 }
  0x22   : > { %s1105_s6 = scalar_lea.hbm %s1553_s0, %s793_s30 }
  0x23   : > { %s921_s7 = scalar_lea.hbm %s1105_s6, %s1094_s26  ;;  %p926_p3 = scmp.lt.u32.totalorder %s1105_s6, %s1553_s0 }
  0x24   : > { %p922_p0 = scmp.ne.s32.totalorder %s1105_s6, %s921_s7  ;;  %p927_p4 = scmp.lt.u32.totalorder %s925_s16, %s921_s7 }
  0x25   : > { %p929_p7 = scmp.lt.u32.totalorder %s921_s7, %s1105_s6 }
  0x26   : > { %p923_p1 = pnand %p922_p0, %p778_p13  ;;  %p928_p5 = por %p927_p4, %p926_p3 }
  0x28   : > { %p924_p2 = pneg %p923_p1  ;;  %p930_p8 = por %p929_p7, %p928_p5 }
  0x2a   : > { %p931_p12 = pnand %p930_p8, %p924_p2 }
  0x2c   : > { %934 = shalt.err (!%p931_p12)
}
  0x2d   : > { %s935_s23 = scalar_lea.vmem %s1107_s3, %s1094_s26  ;;  %s1017_s24 = smov [#allocation2]  }
  0x2e   : > { %p936_p0 = scmp.ne.s32.totalorder %s1107_s3, %s935_s23  ;;  %s939_s25 = sshll.u32 %s1017_s24, 4  ;;  %s940_s25 = int_to_ptr.vmem [resolvable:$false] %s939_s25 }
  0x2f   : > { %s941_s27 = scalar_lea.vmem %s940_s25, 6656  ;;  %p942_p10 = scmp.lt.s32.totalorder %s1107_s3, %s940_s25 }
  0x30   : > { %p937_p1 = pnand %p936_p0, %p778_p13  ;;  %p943_p3 = scmp.lt.s32.totalorder %s941_s27, %s935_s23 }
  0x32   : > { %p938_p11 = pneg %p937_p1  ;;  %p944_p4 = por %p943_p3, %p942_p10 }
  0x34   : > { %p945_p5 = pnand %p944_p4, %p938_p11 }
  0x36   : > { %948 = shalt.err (!%p945_p5)
}
  0x37   : > { %s1018_s29 = smov 256   ;;  %s1019_s30 = smov 16  }
  0x38   : > { %139 = dma.hbm_to_vmem [thread:$0]  (%p778_p13), %s1105_s6, %s1094_s26, %s1107_s3, %s1097_s28, %s1018_s29, %s1018_s29, %s1019_s30  }
  0x39 PF: > { %p783_p2 = scmp.ge.s32.totalorder %s1015_s12, 1  ;;  %p158_p7 = scmp.lt.s32.totalorder %s1015_s12, 3 }
  0x3b   : > { %p159_p8 = pnand %p783_p2, %p158_p7 }
  0x3c   : > { %s1137_s4 = sand.u32 (!%p159_p8), 1, %s1007_s10  }
  0x3d   : > { %162 = sbr.rel (%p159_p8) target bundleno = 666 (0x29a), region = 28  ;;  %s165_s7 = scalar_lea.sflag (!%p159_p8), [#allocation3], %s1137_s4 }
  0x3e   : > { %s795_s5 = smul.u32 (!%p159_p8), 208, %s1137_s4 }
  0x40   : > { %s1141_s8 = scalar_lea.vmem (!%p159_p8), [#allocation2], %s795_s5 }
  0x44   : > { %994 = dma.done.wait (%p1076_p6), %s165_s7, 3328  }
  0x45   : > { %996 = vsyncadd (%p1076_p6), %s165_s7, 4294963968  ;;  %v1020_v0 = vmov 0   ;;  %v1148_v1 = vld [vmem:[%s1141_s8 + $0x20] sm:$0xff]  ;;  %v1151_v2 = vld [vmem:[%s1141_s8 + $0x28] sm:$0xff]  ;;  %s204_s19 = smul.u32 13, %s1058_s13  ;;  %v309_v63 = vlaneseq  ;;  %s784_s16 = sshll.u32 %s1137_s4, 3 }
  0x46   : > { %841 = vset.pattern.permute.xlu1 %v1020_v0  ;;  %842 = vset.pattern.permute.xlu0 %v1020_v0  ;;  %v1154_v3 = vld [vmem:[%s1141_s8] sm:$0xff]  ;;  %v250_v4 = vmax.f32 %v1148_v1, %v1151_v2  ;;  %v1159_v5 = vld [vmem:[%s1141_s8 + $0x8] sm:$0xff]  ;;  %v1162_v6 = vld [vmem:[%s1141_s8 + $0x30] sm:$0xff]  ;;  %s585_s14 = smul.u32 104, %s1058_s13  ;;  %s197_s17 = scalar_lea.vmem [#allocation5], %s784_s16 }
  0x47   : > { %v1165_v7 = vld [vmem:[%s1141_s8 + $0x38] sm:$0xff]  ;;  %v244_v8 = vmax.f32 %v1154_v3, %v1159_v5  ;;  %v1170_v9 = vld [vmem:[%s1141_s8 + $0x10] sm:$0xff]  ;;  %v1186_v15 = vld [vmem:[%s1141_s8 + $0x40] sm:$0xff]  ;;  %p209_p6 = scmp.lt.s32.totalorder %s204_s19, 24  ;;  %s691_s22 = sshll.u32 %s197_s17, 4  ;;  %s1506_s22 = int_to_ptr.vmem [resolvable:$true] %s691_s22 }
  0x48   : > { %v1173_v10 = vld [vmem:[%s1141_s8 + $0x18] sm:$0xff]  ;;  %251 = vmax.xlane.f32.xlu1 %v250_v4  ;;  %v253_v11 = vmax.f32 %v1162_v6, %v1165_v7  ;;  %v1180_v13 = vld [vmem:[%s1141_s8 + $0x50] sm:$0xff]  ;;  %v1189_v16 = vld [vmem:[%s1141_s8 + $0x48] sm:$0xff]  ;;  %s787_s23 = sshll.u32 %s1058_s13, 7  ;;  %s678_s30 = scalar_lea.sflag [#allocation4], %s1137_s4 }
  0x49   : > { %245 = vmax.xlane.f32.xlu0 %v244_v8  ;;  %v247_v12 = vmax.f32 %v1170_v9, %v1173_v10  ;;  %v1183_v14 = vld [vmem:[%s1141_s8 + $0x58] sm:$0xff]  ;;  %v256_v18 = vmax.f32 %v1186_v15, %v1189_v16  ;;  %v1196_v19 = vld [vmem:[%s1141_s8 + $0x70] sm:$0xff]  ;;  %v1202_v21 = vld [vmem:[%s1141_s8 + $0x60] sm:$0xff]  ;;  %s1569_s19 = smov (!%p209_p6, %s204_s19), 24  ;;  %s1511_s29 = scalar_lea.hbm %s1555_s2, %s787_s23 }
  0x4a   : > { %v259_v17 = vmax.f32 %v1180_v13, %v1183_v14  ;;  %v1199_v20 = vld [vmem:[%s1141_s8 + $0x78] sm:$0xff]  ;;  %v1205_v22 = vld [vmem:[%s1141_s8 + $0x68] sm:$0xff]  ;;  %v1212_v25 = vld [vmem:[%s1141_s8 + $0x90] sm:$0xff]  ;;  %s785_s26 = sshll.u32 %s1569_s19, 3  ;;  %s949_s5 = scalar_lea.vmem %s1506_s22, 128 }
  0x4b   : > { %v265_v23 = vmax.f32 %v1196_v19, %v1199_v20  ;;  %v262_v24 = vmax.f32 %v1202_v21, %v1205_v22  ;;  %v1215_v26 = vld [vmem:[%s1141_s8 + $0x98] sm:$0xff]  ;;  %v1218_v27 = vld [vmem:[%s1141_s8 + $0x80] sm:$0xff]  ;;  %v1221_v28 = vld [vmem:[%s1141_s8 + $0x88] sm:$0xff]  ;;  %s212_s6 = scalar_lea.vmem %s1554_s1, %s785_s26  ;;  %p950_p10 = scmp.ne.s32.totalorder %s1506_s22, %s949_s5 }
  0x4c   : > { %254 = vmax.xlane.f32.xlu1 %v253_v11  ;;  %v271_v29 = vmax.f32 %v1212_v25, %v1215_v26  ;;  %v268_v30 = vmax.f32 %v1218_v27, %v1221_v28  ;;  %v1228_v31 = vld [vmem:[%s1141_s8 + $0xb0] sm:$0xff]  ;;  %v1231_v32 = vld [vmem:[%s1141_s8 + $0xb8] sm:$0xff]  ;;  %v1234_v33 = vld [vmem:[%s1141_s8 + $0xa0] sm:$0xff]  ;;  %s1021_s13 = smov [#allocation5]  }
  0x4d   : > { %248 = vmax.xlane.f32.xlu0 %v247_v12  ;;  %v1237_v34 = vld [vmem:[%s1141_s8 + $0xa8] sm:$0xff]  ;;  %v277_v35 = vmax.f32 %v1228_v31, %v1231_v32  ;;  %v1245_v37 = vld [vmem:[%s1141_s8 + $0xc0] sm:$0xff]  ;;  %p951_p11 = pnand %p950_p10, %p1081_p9  ;;  %s953_s7 = sshll.u32 %s1021_s13, 4  ;;  %s954_s7 = int_to_ptr.vmem [resolvable:$false] %s953_s7 }
  0x4e   : > { %v274_v36 = vmax.f32 %v1234_v33, %v1237_v34  ;;  %v1248_v38 = vld [vmem:[%s1141_s8 + $0xc8] sm:$0xff]  ;;  %v312_v40 = vld [vmem:[%s212_s6] sm:$0xff]  ;;  %v314_v41 = vld [vmem:[%s212_s6 + $0x10] sm:$0xff]  ;;  %s955_s8 = scalar_lea.vmem %s954_s7, 256  ;;  %p956_p12 = scmp.lt.s32.totalorder %s1506_s22, %s954_s7 }
  0x4f   : > { %v280_v39 = vmax.f32 %v1245_v37, %v1248_v38  ;;  %v315_v42 = vld [vmem:[%s212_s6 + $0x18] sm:$0xff]  ;;  %v313_v43 = vld [vmem:[%s212_s6 + $0x8] sm:$0xff]  ;;  %v316_v44 = vld [vmem:[%s212_s6 + $0x20] sm:$0xff]  ;;  %p952_p13 = pneg %p951_p11  ;;  %p957_p0 = scmp.lt.s32.totalorder %s955_s8, %s949_s5 }
  0x50   : > { %260 = vmax.xlane.f32.xlu1 %v259_v17  ;;  %v322_v45 = vld [vmem:[%s212_s6 + $0x50] sm:$0xff]  ;;  %v317_v46 = vld [vmem:[%s212_s6 + $0x28] sm:$0xff]  ;;  %v324_v47 = vld [vmem:[%s212_s6 + $0x60] sm:$0xff] }
  0x51   : > { %257 = vmax.xlane.f32.xlu0 %v256_v18  ;;  %v318_v48 = vld [vmem:[%s212_s6 + $0x30] sm:$0xff]  ;;  %v319_v49 = vld [vmem:[%s212_s6 + $0x38] sm:$0xff]  ;;  %v320_v50 = vld [vmem:[%s212_s6 + $0x40] sm:$0xff]  ;;  %p958_p1 = por %p957_p0, %p956_p12 }
  0x52   : > { %v321_v51 = vld [vmem:[%s212_s6 + $0x48] sm:$0xff]  ;;  %v323_v52 = vld [vmem:[%s212_s6 + $0x58] sm:$0xff] }
  0x53   : > { %p959_p3 = pnand %p958_p1, %p952_p13 }
  0x54   : > { %266 = vmax.xlane.f32.xlu1 %v265_v23 }
  0x55   : > { %263 = vmax.xlane.f32.xlu0 %v262_v24 }
  0x58   : > { %272 = vmax.xlane.f32.xlu1 %v271_v29 }
  0x59   : > { %269 = vmax.xlane.f32.xlu0 %v268_v30 }
  0x5c   : > { %278 = vmax.xlane.f32.xlu1 %v277_v35 }
  0x5d   : > { %275 = vmax.xlane.f32.xlu0 %v274_v36 }
  0x61   : > { %281 = vmax.xlane.f32.xlu0 %v280_v39 }
  0x6d   : > { %326 = vperm.xlu1 %841, %v312_v40  }
  0x71   : > { %332 = vperm.xlu1 %841, %v314_v41  }
  0x75   : > { %335 = vperm.xlu1 %841, %v315_v42  }
  0x77   : > { %329 = vperm.xlu0 %842, %v313_v43  }
  0x79   : > { %338 = vperm.xlu1 %841, %v316_v44  }
  0x7b   : > { %356 = vperm.xlu0 %842, %v322_v45  }
  0x7d   : > { %341 = vperm.xlu1 %841, %v317_v46  }
  0x7f   : > { %362 = vperm.xlu0 %842, %v324_v47  }
  0x81   : > { %344 = vperm.xlu1 %841, %v318_v48  }
  0x85   : > { %347 = vperm.xlu1 %841, %v319_v49  }
  0x89   : > { %350 = vperm.xlu1 %841, %v320_v50  }
  0x8d   : > { %353 = vperm.xlu1 %841, %v321_v51  }
  0x91   : > { %359 = vperm.xlu1 %841, %v323_v52  }
  0xd5   : > { %v252_v53 = vpop.xlane.xlu1 %251 }
  0xd6   : > { %v246_v54 = vpop.xlane.xlu0 %245  ;;  %v1266_v0 = vsub.f32 %v1148_v1, %v252_v53  ;;  %v1270_v8 = vsub.f32 %v1151_v2, %v252_v53 }
  0xd7   : > { %v284_v24 = vsub.f32 %v1159_v5, %v246_v54 }
  0xd8   : > { %v463_v18 = vmul.f32 1.442695, %v1266_v0  ;;  %v465_v23 = vmul.f32 1.442695, %v1270_v8 }
  0xd9   : > { %v255_v55 = vpop.xlane.xlu1 %254  ;;  %v457_v40 = vmul.f32 1.442695, %v284_v24 }
  0xda   : > { %v249_v56 = vpop.xlane.xlu0 %248  ;;  %v1289_v30 = vsub.f32 %v1162_v6, %v255_v55  ;;  %v1303_v6 = vsub.f32 %v1165_v7, %v255_v55 }
  0xdb   : > { %v1258_v59 = vsub.f32 %v1170_v9, %v249_v56  ;;  %v1261_v60 = vsub.f32 %v1173_v10, %v249_v56  ;;  %v283_v9 = vsub.f32 %v1154_v3, %v246_v54  ;;  %v1275_v10 = vand.u32 127, %v309_v63 }
  0xdc   : > { %v467_v42 = vmul.f32 1.442695, %v1289_v30 }
  0xdd   : > { %v1255_v57 = vpop.xlane.xlu1 %260  ;;  %v459_v4 = vmul.f32 1.442695, %v1258_v59  ;;  %v461_v11 = vmul.f32 1.442695, %v1261_v60  ;;  %v455_v3 = vmul.f32 1.442695, %v283_v9 }
  0xde   : > { %v258_v58 = vpop.xlane.xlu0 %257  ;;  %v1292_v35 = vadd.s32 128, %v1275_v10  ;;  %v1319_v47 = vsub.f32 %v1180_v13, %v1255_v57  ;;  %v1333_v55 = vsub.f32 %v1183_v14, %v1255_v57 }
  0xdf   : > { %843 = vpow2.f32 %v459_v4  ;;  %v1279_v1 = vsub.f32 %v1186_v15, %v258_v58  ;;  %v1283_v2 = vsub.f32 %v1189_v16, %v258_v58 }
  0xe0   : > { %845 = vpow2.f32 %v461_v11 }
  0xe1   : > { %v1263_v61 = vpop.xlane.xlu1 %266  ;;  %847 = vpow2.f32 %v463_v18  ;;  %v471_v15 = vmul.f32 1.442695, %v1279_v1  ;;  %v473_v16 = vmul.f32 1.442695, %v1283_v2  ;;  %v477_v18 = vmul.f32 1.442695, %v1333_v55 }
  0xe2   : > { %v264_v62 = vpop.xlane.xlu0 %263  ;;  %849 = vpow2.f32 %v465_v23  ;;  %v1355_v23 = vsub.f32 %v1196_v19, %v1263_v61 }
  0xe3   : > { %v1296_v36 = vsub.f32 %v1202_v21, %v264_v62  ;;  %v1300_v5 = vsub.f32 %v1205_v22, %v264_v62  ;;  %851 = vpow2.f32 %v455_v3 }
  0xe4   : > { %853 = vpow2.f32 %v471_v15 }
  0xe5   : > { %v273_v12 = vpop.xlane.xlu1 %272  ;;  %v479_v21 = vmul.f32 1.442695, %v1296_v36  ;;  %855 = vpow2.f32 %v473_v16  ;;  %v481_v44 = vmul.f32 1.442695, %v1300_v5 }
  0xe6   : > { %v270_v17 = vpop.xlane.xlu0 %269  ;;  %857 = vpow2.f32 %v457_v40  ;;  %v1322_v51 = vsub.f32 %v1212_v25, %v273_v12  ;;  %v1325_v52 = vsub.f32 %v1215_v26, %v273_v12  ;;  %v475_v25 = vmul.f32 1.442695, %v1319_v47 }
  0xe7   : > { %v1307_v43 = vsub.f32 %v1218_v27, %v270_v17  ;;  %v1314_v7 = vsub.f32 %v1221_v28, %v270_v17  ;;  %v469_v27 = vmul.f32 1.442695, %v1303_v6  ;;  %859 = vpow2.f32 %v467_v42 }
  0xe8   : > { %861 = vpow2.f32 %v479_v21  ;;  %v491_v62 = vmul.f32 1.442695, %v1322_v51  ;;  %v493_v4 = vmul.f32 1.442695, %v1325_v52 }
  0xe9   : > { %v1286_v29 = vpop.xlane.xlu1 %278  ;;  %v844_v46 = vpop.eup %843  ;;  %v487_v28 = vmul.f32 1.442695, %v1307_v43  ;;  %863 = vpow2.f32 %v481_v44  ;;  %v489_v13 = vmul.f32 1.442695, %v1314_v7 }
  0xea   : > { %v276_v39 = vpop.xlane.xlu0 %275  ;;  %v846_v50 = vpop.eup %845  ;;  %865 = vpow2.f32 %v469_v27 }
  0xeb   : > { %v848_v54 = vpop.eup %847  ;;  %v510_v26 = vadd.f32 %v846_v50, %v844_v46  ;;  %867 = vpow2.f32 %v487_v28  ;;  %v1339_v11 = vsub.f32 %v1234_v33, %v276_v39  ;;  %v1348_v14 = vsub.f32 %v1237_v34, %v276_v39 }
  0xec   : > { %v850_v58 = vpop.eup %849  ;;  %869 = vpow2.f32 %v489_v13  ;;  %v1361_v34 = vsub.f32 %v1199_v20, %v1263_v61  ;;  %v1371_v39 = vsub.f32 %v1228_v31, %v1286_v29  ;;  %v1378_v61 = vsub.f32 %v1231_v32, %v1286_v29 }
  0xed   : > { %v327_v41 = vpop.permute.xlu1 %326  ;;  %v1341_v12 = vpop.eup %851  ;;  %v513_v3 = vadd.f32 %v850_v58, %v848_v54  ;;  %871 = vpow2.f32 %v491_v62  ;;  %v495_v40 = vmul.f32 1.442695, %v1339_v11  ;;  %v483_v31 = vmul.f32 1.442695, %v1355_v23 }
  0xee   : > { %vm364_vm0 = vcmp.eq.s32.totalorder %v1275_v10, %v327_v41  ;;  %vm365_vm1 = vcmp.eq.s32.totalorder %v1292_v35, %v327_v41  ;;  %v1328_v53 = vpop.xlane.xlu0 %281  ;;  %v854_v17 = vpop.eup %853  ;;  %873 = vpow2.f32 %v493_v4  ;;  %v485_v44 = vmul.f32 1.442695, %v1361_v34 }
  0xef   : > { %v390_v22 = vsel %vm364_vm0, %v283_v9, 0.0  ;;  %v391_v45 = vsel %vm365_vm1, %v284_v24, 0.0  ;;  %v856_v16 = vpop.eup %855  ;;  %875 = vpow2.f32 %v475_v25  ;;  %v499_v46 = vmul.f32 1.442695, %v1371_v39 }
  0xf0   : > { %v416_v49 = vadd.f32 %v391_v45, %v390_v22  ;;  %v858_v19 = vpop.eup %857  ;;  %v519_v42 = vadd.f32 %v856_v16, %v854_v17  ;;  %877 = vpow2.f32 %v477_v18  ;;  %v1394_v27 = vsub.f32 %v1245_v37, %v1328_v53 }
  0xf1   : > { %v333_v48 = vpop.permute.xlu1 %332  ;;  %v860_v20 = vpop.eup %859  ;;  %879 = vpow2.f32 %v495_v40 }
  0xf2   : > { %417 = vadd.xlane.f32.xlu0 %v416_v49  ;;  %vm368_vm2 = vcmp.eq.s32.totalorder %v1275_v10, %v333_v48  ;;  %vm369_vm3 = vcmp.eq.s32.totalorder %v1292_v35, %v333_v48  ;;  %v501_v49 = vmul.f32 1.442695, %v1378_v61  ;;  %v503_v37 = vmul.f32 1.442695, %v1394_v27 }
  0xf5   : > { %v336_v56 = vpop.permute.xlu1 %335 }
  0xf6   : > { %v330_v9 = vpop.permute.xlu0 %329  ;;  %511 = vadd.xlane.f32.xlu0 %v510_v26  ;;  %vm370_vm6 = vcmp.eq.s32.totalorder %v1275_v10, %v336_v56  ;;  %vm371_vm7 = vcmp.eq.s32.totalorder %v1292_v35, %v336_v56 }
  0xf7   : > { %vm366_vm4 = vcmp.eq.s32.totalorder %v1275_v10, %v330_v9  ;;  %vm367_vm5 = vcmp.eq.s32.totalorder %v1292_v35, %v330_v9  ;;  %v396_v45 = vsel %vm370_vm6, %v1289_v30, 0.0  ;;  %v397_v32 = vsel %vm371_vm7, %v1303_v6, 0.0 }
  0xf8   : > { %v392_v57 = vsel %vm366_vm4, %v1258_v59, 0.0  ;;  %v393_v33 = vsel %vm367_vm5, %v1261_v60, 0.0  ;;  %v394_v59 = vsel %vm368_vm2, %v1266_v0, 0.0  ;;  %v395_v60 = vsel %vm369_vm3, %v1270_v8, 0.0  ;;  %v862_v8 = vpop.eup %861 }
  0xf9   : > { %v1357_v24 = vpop.permute.xlu1 %338  ;;  %v419_v15 = vadd.f32 %v393_v33, %v392_v57  ;;  %v497_v0 = vmul.f32 1.442695, %v1348_v14  ;;  %v422_v21 = vadd.f32 %v395_v60, %v394_v59  ;;  %v864_v22 = vpop.eup %863  ;;  %v1399_v30 = vsub.f32 %v1248_v38, %v1328_v53 }
  0xfa   : > { %514 = vadd.xlane.f32.xlu0 %v513_v3  ;;  %v866_v29 = vpop.eup %865  ;;  %v525_v50 = vadd.f32 %v864_v22, %v862_v8  ;;  %v425_v28 = vadd.f32 %v397_v32, %v396_v45  ;;  %v507_v38 = vadd.f32 %v858_v19, %v1341_v12  ;;  %vm372_vm8 = vcmp.eq.s32.totalorder %v1275_v10, %v1357_v24  ;;  %v357_v32 = vpop.permute.xlu0 %356 }
  0xfb   : > { %420 = vadd.xlane.f32.xlu1 %v419_v15  ;;  %v868_v48 = vpop.eup %867  ;;  %881 = vpow2.f32 %v497_v0  ;;  %v505_v25 = vmul.f32 1.442695, %v1399_v30  ;;  %v516_v57 = vadd.f32 %v866_v29, %v860_v20  ;;  %vm373_vm9 = vcmp.eq.s32.totalorder %v1292_v35, %v1357_v24 }
  0xfc   : > { %883 = vpow2.f32 %v483_v31  ;;  %v870_v13 = vpop.eup %869  ;;  %v398_v8 = vsel %vm372_vm8, %v1279_v1, 0.0  ;;  %v399_v31 = vsel %vm373_vm9, %v1283_v2, 0.0  ;;  %vm384_vm6 = vcmp.eq.s32.totalorder %v1275_v10, %v357_v32 }
  0xfd   : > { %v1382_v41 = vpop.permute.xlu1 %341  ;;  %885 = vpow2.f32 %v485_v44  ;;  %v872_v54 = vpop.eup %871  ;;  %v531_v56 = vadd.f32 %v870_v13, %v868_v48  ;;  %vm385_vm7 = vcmp.eq.s32.totalorder %v1292_v35, %v357_v32 }
  0xfe   : > { %520 = vadd.xlane.f32.xlu0 %v519_v42  ;;  %887 = vpow2.f32 %v499_v46  ;;  %v874_v53 = vpop.eup %873  ;;  %vm374_vm10 = vcmp.eq.s32.totalorder %v1275_v10, %v1382_v41  ;;  %vm375_vm11 = vcmp.eq.s32.totalorder %v1292_v35, %v1382_v41  ;;  %v428_v42 = vadd.f32 %v399_v31, %v398_v8 }
  0xff   : > { %423 = vadd.xlane.f32.xlu1 %v422_v21  ;;  %889 = vpow2.f32 %v501_v49  ;;  %v876_v58 = vpop.eup %875  ;;  %v534_v9 = vadd.f32 %v874_v53, %v872_v54  ;;  %v400_v21 = vsel %vm374_vm10, %v1319_v47, 0.0  ;;  %v401_v22 = vsel %vm375_vm11, %v1333_v55, 0.0 }
 0x100   : > { %891 = vpow2.f32 %v503_v37  ;;  %v878_v62 = vpop.eup %877  ;;  %v431_v44 = vadd.f32 %v401_v22, %v400_v21  ;;  %vm640_vm11 = vcmask 7168  }
 0x101   : > { %v1401_v6 = vpop.permute.xlu1 %344  ;;  %893 = vpow2.f32 %v505_v25  ;;  %v880_v4 = vpop.eup %879  ;;  %v522_v12 = vadd.f32 %v878_v62, %v876_v58 }
 0x102   : > { %526 = vadd.xlane.f32.xlu0 %v525_v50  ;;  %vm376_vm14 = vcmp.eq.s32.totalorder %v1275_v10, %v1401_v6  ;;  %vm377_vm15 = vcmp.eq.s32.totalorder %v1292_v35, %v1401_v6  ;;  %v410_v50 = vsel %vm384_vm6, %v1339_v11, 0.0 }
 0x103   : > { %426 = vadd.xlane.f32.xlu1 %v425_v28  ;;  %v402_v45 = vsel %vm376_vm14, %v1296_v36, 0.0  ;;  %v411_v28 = vsel %vm385_vm7, %v1348_v14, 0.0 }
 0x105   : > { %v348_v26 = vpop.permute.xlu1 %347  ;;  %v882_v33 = vpop.eup %881 }
 0x106   : > { %532 = vadd.xlane.f32.xlu0 %v531_v56  ;;  %v884_v17 = vpop.eup %883  ;;  %v537_v16 = vadd.f32 %v882_v33, %v880_v4  ;;  %vm378_vm12 = vcmp.eq.s32.totalorder %v1275_v10, %v348_v26  ;;  %vm379_vm13 = vcmp.eq.s32.totalorder %v1292_v35, %v348_v26  ;;  %v1457_v26 = vstv %s585_s14 }
 0x107   : > { %508 = vadd.xlane.f32.xlu1 %v507_v38  ;;  %v886_v18 = vpop.eup %885  ;;  %v404_v1 = vsel %vm378_vm12, %v1355_v23, 0.0  ;;  %v405_v2 = vsel %vm379_vm13, %v1361_v34, 0.0  ;;  %v403_v34 = vsel %vm377_vm15, %v1300_v5, 0.0  ;;  %v363_v5 = vpop.permute.xlu0 %362 }
 0x108   : > { %v888_v15 = vpop.eup %887  ;;  %v528_v40 = vadd.f32 %v886_v18, %v884_v17  ;;  %v437_v47 = vadd.f32 %v405_v2, %v404_v1  ;;  %v434_v46 = vadd.f32 %v403_v34, %v402_v45  ;;  %vm388_vm8 = vcmp.eq.s32.totalorder %v1275_v10, %v363_v5 }
 0x109   : > { %v351_v3 = vpop.permute.xlu1 %350  ;;  %v890_v59 = vpop.eup %889  ;;  %vm389_vm9 = vcmp.eq.s32.totalorder %v1292_v35, %v363_v5 }
 0x10a   : > { %535 = vadd.xlane.f32.xlu0 %v534_v9  ;;  %v892_v60 = vpop.eup %891  ;;  %v540_v19 = vadd.f32 %v890_v59, %v888_v15  ;;  %vm380_vm2 = vcmp.eq.s32.totalorder %v1275_v10, %v351_v3  ;;  %vm381_vm3 = vcmp.eq.s32.totalorder %v1292_v35, %v351_v3 }
 0x10b   : > { %517 = vadd.xlane.f32.xlu1 %v516_v57  ;;  %v894_v20 = vpop.eup %893 }
 0x10c   : > { %v543_v24 = vadd.f32 %v894_v20, %v892_v60 }
 0x10d   : > { %v354_v0 = vpop.permute.xlu1 %353 }
 0x10e   : > { %538 = vadd.xlane.f32.xlu0 %v537_v16  ;;  %vm382_vm0 = vcmp.eq.s32.totalorder %v1275_v10, %v354_v0  ;;  %vm383_vm1 = vcmp.eq.s32.totalorder %v1292_v35, %v354_v0 }
 0x10f   : > { %523 = vadd.xlane.f32.xlu1 %v522_v12  ;;  %v408_v23 = vsel %vm382_vm0, %v1322_v51, 0.0  ;;  %v409_v55 = vsel %vm383_vm1, %v1325_v52, 0.0  ;;  %v406_v51 = vsel %vm380_vm2, %v1307_v43, 0.0  ;;  %v407_v52 = vsel %vm381_vm3, %v1314_v7, 0.0 }
 0x110   : > { %v443_v29 = vadd.f32 %v409_v55, %v408_v23  ;;  %v440_v6 = vadd.f32 %v407_v52, %v406_v51  ;;  %v446_v43 = vadd.f32 %v411_v28, %v410_v50  ;;  %v414_v7 = vsel %vm388_vm8, %v1394_v27, 0.0 }
 0x111   : > { %v360_v41 = vpop.permute.xlu1 %359  ;;  %v1453_v27 = vshrl.u32 %v309_v63, 7 }
 0x112   : > { %541 = vadd.xlane.f32.xlu0 %v540_v19  ;;  %vm386_vm4 = vcmp.eq.s32.totalorder %v1275_v10, %v360_v41  ;;  %vm387_vm5 = vcmp.eq.s32.totalorder %v1292_v35, %v360_v41 }
 0x113   : > { %529 = vadd.xlane.f32.xlu1 %v528_v40  ;;  %v412_v36 = vsel %vm386_vm4, %v1371_v39, 0.0  ;;  %v413_v48 = vsel %vm387_vm5, %v1378_v61, 0.0  ;;  %v415_v39 = vsel %vm389_vm9, %v1399_v30, 0.0  ;;  %v588_v53 = vadd.s32 8, %v1453_v27 }
 0x114   : > { %v449_v49 = vadd.f32 %v413_v48, %v412_v36  ;;  %v452_v61 = vadd.f32 %v415_v39, %v414_v7  ;;  %v589_v58 = vadd.s32 16, %v1453_v27  ;;  %v590_v57 = vadd.s32 24, %v1453_v27 }
 0x115   : > { %v591_v63 = vadd.s32 32, %v1453_v27  ;;  %v602_v17 = vadd.s32 %v1457_v26, %v588_v53  ;;  %v601_v12 = vadd.s32 %v1457_v26, %v1453_v27  ;;  %v592_v40 = vadd.s32 40, %v1453_v27 }
 0x116   : > { %544 = vadd.xlane.f32.xlu0 %v543_v24  ;;  %v603_v18 = vadd.s32 %v1457_v26, %v589_v58  ;;  %v604_v59 = vadd.s32 %v1457_v26, %v590_v57  ;;  %v596_v45 = vadd.s32 72, %v1453_v27  ;;  %v595_v50 = vadd.s32 64, %v1453_v27 }
 0x117   : > { %429 = vadd.xlane.f32.xlu1 %v428_v42  ;;  %v605_v60 = vadd.s32 %v1457_v26, %v591_v63  ;;  %vm615_vm10 = vcmp.lt.s32.totalorder %v602_v17, 200  ;;  %vm614_vm13 = vcmp.lt.s32.totalorder %v601_v12, 200  ;;  %v606_v2 = vadd.s32 %v1457_v26, %v592_v40 }
 0x118   : > { %vm616_vm12 = vcmp.lt.s32.totalorder %v603_v18, 200  ;;  %vm617_vm14 = vcmp.lt.s32.totalorder %v604_v59, 200  ;;  %v609_v58 = vadd.s32 %v1457_v26, %v595_v50  ;;  %v597_v17 = vadd.s32 80, %v1453_v27 }
 0x119   : > { %vm618_vm15 = vcmp.lt.s32.totalorder %v605_v60, 200  ;;  %vm619_vm0 = vcmp.lt.s32.totalorder %v606_v2, 200 }
 0x11a   : > { %438 = vadd.xlane.f32.xlu0 %v437_v47  ;;  %v594_v47 = vadd.s32 56, %v1453_v27  ;;  %vm622_vm4 = vcmp.lt.s32.totalorder %v609_v58, 200 }
 0x11b   : > { %432 = vadd.xlane.f32.xlu1 %v431_v44  ;;  %v593_v44 = vadd.s32 48, %v1453_v27 }
 0x11e   : > { %444 = vadd.xlane.f32.xlu0 %v443_v29 }
 0x11f   : > { %435 = vadd.xlane.f32.xlu1 %v434_v46 }
 0x122   : > { %450 = vadd.xlane.f32.xlu0 %v449_v49 }
 0x123   : > { %441 = vadd.xlane.f32.xlu1 %v440_v6  ;;  %v607_v6 = vadd.s32 %v1457_v26, %v593_v44 }
 0x125   : > { %vm620_vm1 = vcmp.lt.s32.totalorder %v607_v6, 200 }
 0x127   : > { %447 = vadd.xlane.f32.xlu1 %v446_v43 }
 0x12b   : > { %453 = vadd.xlane.f32.xlu1 %v452_v61 }
 0x17f   : > { %v1448_v13 = vpop.xlane.xlu0 %417 }
 0x183   : > { %v512_v11 = vpop.xlane.xlu0 %511 }
 0x184   : > { %895 = vlog2.f32 %v512_v11 }
 0x187   : > { %v515_v14 = vpop.xlane.xlu0 %514 }
 0x188   : > { %v421_v37 = vpop.xlane.xlu1 %420  ;;  %897 = vlog2.f32 %v515_v14  ;;  %v608_v14 = vadd.s32 %v1457_v26, %v594_v47 }
 0x18a   : > { %vm621_vm2 = vcmp.lt.s32.totalorder %v608_v14, 200 }
 0x18b   : > { %v521_v10 = vpop.xlane.xlu0 %520 }
 0x18c   : > { %v424_v54 = vpop.xlane.xlu1 %423 }
 0x18e   : > { %v896_v38 = vpop.eup %895 }
 0x18f   : > { %v527_v25 = vpop.xlane.xlu0 %526  ;;  %v549_v33 = vmul.f32 0.6931472, %v896_v38 }
 0x190   : > { %v1450_v35 = vpop.xlane.xlu1 %426 }
 0x191   : > { %v573_v19 = vsub.f32 %v549_v33, %v421_v37 }
 0x192   : > { %v898_v9 = vpop.eup %897 }
 0x193   : > { %v533_v56 = vpop.xlane.xlu0 %532  ;;  %v551_v3 = vmul.f32 0.6931472, %v898_v9  ;;  %v628_v21 = vsel %vm615_vm10, %v573_v19, 0.0 }
 0x194   : > { %v509_v30 = vpop.xlane.xlu1 %508  ;;  %v642_v46 = vsel %vm640_vm11, %v628_v21, 0.0  ;;  %v611_v21 = vadd.s32 %v1457_v26, %v597_v17 }
 0x195   : > { %899 = vlog2.f32 %v509_v30  ;;  %v574_v8 = vsub.f32 %v551_v3, %v424_v54  ;;  %v610_v54 = vadd.s32 %v1457_v26, %v596_v45  ;;  %v598_v30 = vadd.s32 88, %v1453_v27 }
 0x196   : > { %901 = vlog2.f32 %v521_v10  ;;  %vm624_vm6 = vcmp.lt.s32.totalorder %v611_v21, 200 }
 0x197   : > { %v536_v4 = vpop.xlane.xlu0 %535  ;;  %v629_v32 = vsel %vm616_vm12, %v574_v8, 0.0  ;;  %vm623_vm3 = vcmp.lt.s32.totalorder %v610_v54, 200  ;;  %v612_v60 = vadd.s32 %v1457_v26, %v598_v30 }
 0x198   : > { %v518_v62 = vpop.xlane.xlu1 %517  ;;  %v644_v49 = vsel %vm640_vm11, %v629_v32, 0.0 }
 0x199   : > { %903 = vlog2.f32 %v518_v62  ;;  %vm625_vm5 = vcmp.lt.s32.totalorder %v612_v60, 200 }
 0x19b   : > { %v539_v16 = vpop.xlane.xlu0 %538 }
 0x19c   : > { %v524_v15 = vpop.xlane.xlu1 %523 }
 0x19d   : > { %905 = vlog2.f32 %v524_v15 }
 0x19e   : > { %907 = vlog2.f32 %v527_v25 }
 0x19f   : > { %v900_v20 = vpop.eup %899  ;;  %909 = vlog2.f32 %v536_v4  ;;  %v542_v42 = vpop.xlane.xlu0 %541 }
 0x1a0   : > { %v902_v0 = vpop.eup %901  ;;  %v547_v31 = vmul.f32 0.6931472, %v900_v20  ;;  %v530_v24 = vpop.xlane.xlu1 %529 }
 0x1a1   : > { %911 = vlog2.f32 %v530_v24  ;;  %v555_v41 = vmul.f32 0.6931472, %v902_v0 }
 0x1a2   : > { %v572_v1 = vsub.f32 %v547_v31, %v1448_v13  ;;  %913 = vlog2.f32 %v533_v56 }
 0x1a3   : > { %v904_v22 = vpop.eup %903  ;;  %915 = vlog2.f32 %v542_v42  ;;  %v545_v29 = vpop.xlane.xlu0 %544 }
 0x1a4   : > { %v627_v23 = vsel %vm614_vm13, %v572_v1, 0.0  ;;  %v553_v55 = vmul.f32 0.6931472, %v904_v22  ;;  %v430_v34 = vpop.xlane.xlu1 %429  ;;  %917 = vlog2.f32 %v539_v16  ;;  %v599_v1 = vadd.s32 96, %v1453_v27 }
 0x1a5   : > { %v641_v36 = vsel %vm640_vm11, %v627_v23, 0.0  ;;  %v576_v48 = vsub.f32 %v555_v41, %v430_v34  ;;  %919 = vlog2.f32 %v545_v29 }
 0x1a6   : > { %v643_v51 = vadd.f32 %v642_v46, %v641_v36  ;;  %v575_v52 = vsub.f32 %v553_v55, %v1450_v35  ;;  %v613_v36 = vadd.s32 %v1457_v26, %v599_v1 }
 0x1a7   : > { %v906_v5 = vpop.eup %905  ;;  %v631_v7 = vsel %vm618_vm15, %v576_v48, 0.0  ;;  %v439_v11 = vpop.xlane.xlu0 %438 }
 0x1a8   : > { %v908_v28 = vpop.eup %907  ;;  %v630_v43 = vsel %vm617_vm14, %v575_v52, 0.0  ;;  %v645_v39 = vadd.f32 %v644_v49, %v643_v51  ;;  %v557_v61 = vmul.f32 0.6931472, %v906_v5  ;;  %v433_v13 = vpop.xlane.xlu1 %432  ;;  %v648_v38 = vsel %vm640_vm11, %v631_v7, 0.0 }
 0x1a9   : > { %v646_v37 = vsel %vm640_vm11, %v630_v43, 0.0  ;;  %v910_v10 = vpop.eup %909  ;;  %v559_v53 = vmul.f32 0.6931472, %v908_v28  ;;  %vm626_vm7 = vcmp.lt.s32.totalorder %v613_v36, 200 }
 0x1aa   : > { %v647_v35 = vadd.f32 %v646_v37, %v645_v39  ;;  %v577_v25 = vsub.f32 %v557_v61, %v433_v13  ;;  %v565_v15 = vmul.f32 0.6931472, %v910_v10 }
 0x1ab   : > { %v912_v56 = vpop.eup %911  ;;  %v445_v33 = vpop.xlane.xlu0 %444 }
 0x1ac   : > { %v914_v62 = vpop.eup %913  ;;  %v649_v4 = vadd.f32 %v648_v38, %v647_v35  ;;  %v632_v9 = vsel %vm619_vm0, %v577_v25, 0.0  ;;  %v561_v57 = vmul.f32 0.6931472, %v912_v56  ;;  %v436_v63 = vpop.xlane.xlu1 %435  ;;  %v581_v20 = vsub.f32 %v565_v15, %v445_v33 }
 0x1ad   : > { %v650_v18 = vsel %vm640_vm11, %v632_v9, 0.0  ;;  %v578_v3 = vsub.f32 %v559_v53, %v436_v63  ;;  %v916_v16 = vpop.eup %915  ;;  %v563_v0 = vmul.f32 0.6931472, %v914_v62 }
 0x1ae   : > { %v651_v12 = vadd.f32 %v650_v18, %v649_v4  ;;  %v579_v59 = vsub.f32 %v561_v57, %v439_v11  ;;  %v918_v19 = vpop.eup %917  ;;  %v569_v47 = vmul.f32 0.6931472, %v916_v16  ;;  %v636_v45 = vsel %vm623_vm3, %v581_v20, 0.0 }
 0x1af   : > { %v633_v40 = vsel %vm620_vm1, %v578_v3, 0.0  ;;  %v451_v42 = vpop.xlane.xlu0 %450  ;;  %v567_v44 = vmul.f32 0.6931472, %v918_v19  ;;  %v920_v34 = vpop.eup %919  ;;  %v658_v51 = vsel %vm640_vm11, %v636_v45, 0.0 }
 0x1b0   : > { %v634_v8 = vsel %vm621_vm2, %v579_v59, 0.0  ;;  %v652_v31 = vsel %vm640_vm11, %v633_v40, 0.0  ;;  %v442_v24 = vpop.xlane.xlu1 %441  ;;  %v583_v55 = vsub.f32 %v569_v47, %v451_v42  ;;  %v571_v6 = vmul.f32 0.6931472, %v920_v34 }
 0x1b1   : > { %v654_v2 = vsel %vm640_vm11, %v634_v8, 0.0  ;;  %v653_v22 = vadd.f32 %v652_v31, %v651_v12  ;;  %v580_v41 = vsub.f32 %v563_v0, %v442_v24 }
 0x1b2   : > { %v638_v52 = vsel %vm625_vm5, %v583_v55, 0.0 }
 0x1b3   : > { %v635_v32 = vsel %vm622_vm4, %v580_v41, 0.0  ;;  %v655_v23 = vadd.f32 %v654_v2, %v653_v22  ;;  %v662_v39 = vsel %vm640_vm11, %v638_v52, 0.0 }
 0x1b4   : > { %v656_v29 = vsel %vm640_vm11, %v635_v32, 0.0  ;;  %v448_v46 = vpop.xlane.xlu1 %447 }
 0x1b5   : > { %v657_v27 = vadd.f32 %v656_v29, %v655_v23  ;;  %v582_v48 = vsub.f32 %v567_v44, %v448_v46 }
 0x1b7   : > { %v637_v5 = vsel %vm624_vm6, %v582_v48, 0.0  ;;  %v659_v49 = vadd.f32 %v658_v51, %v657_v27 }
 0x1b8   : > { %v660_v50 = vsel %vm640_vm11, %v637_v5, 0.0  ;;  %v454_v28 = vpop.xlane.xlu1 %453 }
 0x1b9   : > { %v661_v43 = vadd.f32 %v660_v50, %v659_v49  ;;  %v584_v7 = vsub.f32 %v571_v6, %v454_v28 }
 0x1bb   : > { %v639_v61 = vsel %vm626_vm7, %v584_v7, 0.0  ;;  %v663_v26 = vadd.f32 %v662_v39, %v661_v43 }
 0x1bc   : > { %v664_v13 = vsel %vm640_vm11, %v639_v61, 0.0 }
 0x1bd   : > { %v665_v11 = vadd.f32 %v664_v13, %v663_v26 }
 0x1bf   : > { %666 = vadd.xlane.f32.xlu0 %v665_v11 }
 0x24c   : > { %v667_v37 = vpop.xlane.xlu0 %666 }
 0x24d   : > { %v668_v14 = vrot.slane %v667_v37, 4 }
 0x24f   : > { %v669_v54 = vadd.f32 %v668_v14, %v667_v37 }
 0x251   : > { %v670_v10 = vrot.slane %v669_v54, 2 }
 0x253   : > { %v671_v35 = vadd.f32 %v670_v10, %v669_v54 }
 0x255   : > { %v672_v25 = vrot.slane %v671_v35, 1 }
 0x257   : > { %v673_v30 = vadd.f32 %v672_v25, %v671_v35 }
 0x259   : > { %796 = vpush %v673_v30 }
 0x28a   : > { %s797_s24 = spop %796 }
 0x28b   : > { %v675_v56 = vstv %s797_s24 }
 0x28c   : > { %676 = vst [vmem:[%s197_s17] sm:$0xff] %v675_v56 }
 0x28d   : > { %962 = shalt.err (!%p959_p3)
}
 0x28e   : > { %s963_s4 = scalar_lea.hbm %s1511_s29, 128  ;;  %s967_s28 = scalar_lea.hbm %s1555_s2, 256 }
 0x28f   : > { %p964_p4 = scmp.ne.s32.totalorder %s1511_s29, %s963_s4  ;;  %p968_p7 = scmp.lt.u32.totalorder %s1511_s29, %s1555_s2 }
 0x290   : > { %p969_p8 = scmp.lt.u32.totalorder %s967_s28, %s963_s4  ;;  %p971_p10 = scmp.lt.u32.totalorder %s963_s4, %s1511_s29 }
 0x291   : > { %p965_p5 = pnand %p964_p4, %p1081_p9 }
 0x292   : > { %p970_p6 = por %p969_p8, %p968_p7 }
 0x293   : > { %p966_p2 = pneg %p965_p5 }
 0x294   : > { %p972_p11 = por %p971_p10, %p970_p6 }
 0x296   : > { %p973_p13 = pnand %p972_p11, %p966_p2 }
 0x298   : > { %976 = shalt.err (!%p973_p13)
}
 0x299   : > { %799 = dma.vmem_to_hbm [thread:$0]  (%p1081_p9), %s1506_s22, 128, %s1511_s29, %s678_s30  }
 0x29a PF: > { %s703_s14 = sand.u32 1, %s1003_s9   ;;  %p1560_p12 = scmp.ne.s32.totalorder %s1559_s21, 0 }
 0x29b   : > { %p1561_p0 = scmp.ge.s32.totalorder %s1015_s12, 2  ;;  %s704_s16 = scalar_lea.sflag [#allocation4], %s703_s14 }
 0x29d   : > { %p802_p1 = pnand %p1561_p0, %p1560_p12 }
 0x29f   : > { %998 = dma.done.wait (!%p802_p1), %s704_s16, 128  }
 0x2a0   : > { %1000 = vsyncadd (!%p802_p1), %s704_s16, 4294967168  ;;  %p15_p3 = scmp.ge.s32.totalorder %s1062_s15, 4   ;;  %s1562_s9 = smov %s1007_s10 }
 0x2a1   : > { %s1563_s10 = smov %s1011_s11  ;;  %s1564_s11 = smov %s1074_s18 }
 0x2a2   : > { %s1565_s12 = smov %s1062_s15  ;;  %17 = sbr.rel (!%p15_p3) target bundleno = 5 (0x5), region = 76 }
 0x2a9   :  { %709 = vsyncpa [#allocation3], 1 }
 0x2aa   :  { %711 = vsyncpa [#allocation3 + $0x1], 1 }
 0x2ab   :  { %712 = vsyncpa [#allocation4], 1 }
 0x2ac   :  { %714 = vsyncpa [#allocation4 + $0x1], 1 }

</bundles_post_ra>
